<compile_context>
chip_gen: v7x
topology: tpu7x:2x2x1
jax: 0.10.0
libtpu: 0.0.40
codegen_flags: <defaults>
</compile_context>

<pallas_src>
import jax
import jax.numpy as jnp
from jax.experimental import pallas as pl
from jax.experimental.pallas import tpu as pltpu

D = 4       # ambient dimension
d = 2       # latent dimension
LANE = 128  # TPU vreg lane width


def _round_up(a, b):
    return ((a + b - 1) // b) * b


def _tied_autoencoder_kernel(x_ref, m_ref, o_ref):
    # x_ref: (tr, 128)   m_ref: (128, 128) = kron(I_32, W^T W)   o_ref: (tr, 128)
    # Single dense MXU matmul, f32 accumulation. Casting x to m's dtype enables
    # the optional bf16 operand path (v5e) while keeping f32 I/O.
    x = x_ref[...].astype(m_ref.dtype)
    y = jnp.dot(x, m_ref[...], preferred_element_type=jnp.float32)
    o_ref[...] = y.astype(o_ref.dtype)


def linear_autoencoder(x, W, *, block_rows=4096, compute_dtype=jnp.float32):
    """Tied-weight linear autoencoder forward.

    x: (B, D) float32, W: (d, D) float32 -> (B, D) float32.

    block_rows = rows of the lane-dense reshaped matrix per grid step
    (each reshaped row packs 128/D = 32 batch rows into 128 lanes).
    compute_dtype: matmul operand dtype (f32 default; bf16 recommended on v5e
    to stay on the HBM roofline — accumulation is always f32).
    """
    B, Dx = x.shape
    dW, DW = W.shape
    assert Dx == DW, "feature dims of x and W must match"
    assert LANE % Dx == 0, "this lane-dense packing assumes D divides 128"
    group = LANE // Dx  # 32 batch rows packed per reshaped row

    # Fold encoder+decoder into one (D, D) matrix, then lane-densify it:
    # Mbig = kron(I_group, M) is block-diagonal, so
    #   reshape(x, (B/group, 128)) @ Mbig == reshape(x @ M, (B/group, 128)).
    M = (W.T @ W).astype(compute_dtype)                           # (D, D)
    Mbig = jnp.kron(jnp.eye(group, dtype=compute_dtype), M)       # (128, 128)

    # Row tiling of the reshaped matrix: sublane-aligned (multiple of 8), and
    # keep >= 2 grid steps when the batch allows it so ("parallel",) can shard
    # batch tiles across TensorCores (v7x dual-TC).
    R = -(-B // group)                       # rows after reshape (pre-padding)
    R8 = _round_up(R, 8)
    tr = _round_up(max(8, min(block_rows, R8)), 8)
    if R8 >= 16 and tr >= R8:                # would collapse to a single step
        tr = _round_up(R8 // 2, 8)
    R_pad = _round_up(R8, tr)
    B_pad = R_pad * group

    # Zero-pad the batch; Mbig is block-diagonal so padded rows stay zero and
    # never contaminate real rows.
    if B_pad != B:
        x = jnp.pad(x, ((0, B_pad - B), (0, 0)))
    x_rs = x.reshape(R_pad, LANE)            # free row-major view

    grid = R_pad // tr
    out_rs = pl.pallas_call(
        _tied_autoencoder_kernel,
        out_shape=jax.ShapeDtypeStruct((R_pad, LANE), x.dtype),
        grid_spec=pl.GridSpec(
            grid=(grid,),
            in_specs=[
                # x: one MiB-scale, lane-dense batch slab per grid step
                # (auto double-buffered by the pipeliner).
                pl.BlockSpec((tr, LANE), lambda i: (i, 0)),
                # Mbig: constant block index -> DMA'd once, VMEM-resident for
                # the whole grid (64 KiB; extra pipeline buffer is negligible).
                pl.BlockSpec((LANE, LANE), lambda i: (0, 0)),
            ],
            out_specs=pl.BlockSpec((tr, LANE), lambda i: (i, 0)),
        ),
        compiler_params=pltpu.CompilerParams(
            # Independent batch tiles -> megacore-splittable.
            dimension_semantics=("parallel",),
            # Explicit budget with headroom: default tiles use ~8 MiB
            # double-buffered + 2*64 KiB weight; 32 MiB is safe on
            # v5e (16 MiB scoped default), v6e (128 MiB), v7x (64 MiB phys).
            vmem_limit_bytes=32 * 1024 * 1024,
        ),
    )(x_rs, Mbig)

    return out_rs.reshape(B_pad, Dx)[:B]


if __name__ == "__main__":
    key = jax.random.PRNGKey(0)
    k_w, k_x = jax.random.split(key)

    # Deterministic parameter init: W ~ randn(d, D) / sqrt(d * D)
    W = jax.random.normal(k_w, (d, D), dtype=jnp.float32) / jnp.sqrt(
        jnp.float32(d * D)
    )

    # Small batch of ambient-space inputs built from the lifting map of the
    # reference script: x = Wlift @ (u - 0.5), u ~ U[0,1)^d
    B = 1024  # -> reshaped rows R = 32; block_rows=8 gives a 4-step grid
    Wlift = jnp.array(
        [[1.0, 0.0], [0.0, 1.0], [0.0, 0.2], [0.3, 0.0]], dtype=jnp.float32
    )  # (D, d)
    u = jax.random.uniform(k_x, (B, d), dtype=jnp.float32) - 0.5
    x = u @ Wlift.T  # (B, D)

    # Small block_rows only for the demo grid; production default (4096) moves
    # MiB-scale slabs per grid step.
    y = linear_autoencoder(x, W, block_rows=8)
    y = jax.block_until_ready(y)

    # Reference check against plain JAX: y_ref = (x @ W.T) @ W
    # (kernel computes x @ (W.T @ W); different association, same result well
    # within tolerance at f32).
    y_ref = (x @ W.T) @ W
    assert jnp.allclose(y, y_ref, atol=1e-5, rtol=1e-5), "mismatch vs reference"

    print("KERNEL_OK")
</pallas_src>

<mosaic_0001>
module attributes {stable_mosaic.version = 11 : i64} {
  func.func @_tied_autoencoder_kernel(%arg0: i32, %arg1: memref<8x128xf32, #tpu.memory_space<vmem>>, %arg2: memref<128x128xf32, #tpu.memory_space<vmem>>, %arg3: memref<8x128xf32, #tpu.memory_space<vmem>>) attributes {dimension_semantics = [#tpu.dimension_semantics<parallel>], iteration_bounds = array<i64: 4>, scalar_prefetch = 0 : i64, scratch_operands = 0 : i64, tpu.core_type = #tpu.core_type<tc>, window_params = [{transform_indices = @transform_0, window_bounds = array<i64: 8, 128>}, {pipeline_mode = #tpu.pipeline_mode<synchronous>, transform_indices = @transform_1, window_bounds = array<i64: 128, 128>}, {transform_indices = @transform_2, window_bounds = array<i64: 8, 128>}]} {
    %c0 = arith.constant 0 : index
    %c0_0 = arith.constant 0 : index
    %0 = vector.load %arg1[%c0, %c0_0] : memref<8x128xf32, #tpu.memory_space<vmem>>, vector<8x128xf32>
    %c0_1 = arith.constant 0 : index
    %c0_2 = arith.constant 0 : index
    %1 = vector.load %arg2[%c0_1, %c0_2] : memref<128x128xf32, #tpu.memory_space<vmem>>, vector<128x128xf32>
    %cst = arith.constant dense<0.000000e+00> : vector<8x128xf32>
    %2 = tpu.matmul %0, %1, %cst {dimension_numbers = #tpu.dot_dimension_numbers<[1], [0], [0], [1], [0, 0, 1, 1], [], []>} : vector<8x128xf32>, vector<128x128xf32>, vector<8x128xf32> -> vector<8x128xf32>
    %c0_3 = arith.constant 0 : index
    %c0_4 = arith.constant 0 : index
    %3 = vector.load %arg3[%c0_3, %c0_4] : memref<8x128xf32, #tpu.memory_space<vmem>>, vector<8x128xf32>
    tpu.vector_store %arg3[%c0_3, %c0_4], %2 {strides = array<i32>} : memref<8x128xf32, #tpu.memory_space<vmem>>, vector<8x128xf32>,
    return
  }
  func.func @transform_0(%arg0: i32) -> (i32, i32) {
    %c0_i32 = arith.constant 0 : i32
    %c0_i32_0 = arith.constant 0 : i32
    return %arg0, %c0_i32 : i32, i32
  }
  func.func @transform_1(%arg0: i32) -> (i32, i32) {
    %c0_i32 = arith.constant 0 : i32
    %c0_i32_0 = arith.constant 0 : i32
    %c0_i32_1 = arith.constant 0 : i32
    return %c0_i32, %c0_i32_0 : i32, i32
  }
  func.func @transform_2(%arg0: i32) -> (i32, i32) {
    %c0_i32 = arith.constant 0 : i32
    %c0_i32_0 = arith.constant 0 : i32
    return %arg0, %c0_i32 : i32, i32
  }
}

</mosaic_0001>

<bundles_post_ra>
// kernel: tpu_custom_call.1
= control target key start
LH: loop header
LB: loop body
LE: loop exit
PB: predicated region body
PF: predicated region fallthrough
CT: control target
= control target key end

     0   :  { %7 = vsyncpa [#allocation3], 0  ;;  %s855_s0 = inlined_call_operand.hbm [shape: f32[32,128], index: 0, kind: input, shape index: {}]   ;;  %s856_s1 = inlined_call_operand.hbm [shape: f32[128,128], index: 1, kind: input, shape index: {}]   ;;  %s857_s2 = inlined_call_operand.hbm [shape: f32[32,128], index: 2, kind: output, shape index: {}]  }
   0x1   :  { %9 = vsyncpa [#allocation3 + $0x1], 0 }
   0x2   :  { %10 = vsyncpa [#allocation6], 0 }
   0x3   :  { %11 = vsyncpa [#allocation4], 0 }
   0x4   :  { %13 = vsyncpa [#allocation4 + $0x1], 0  ;;  %s661_s9 = smov 0   ;;  %s663_s10 = smov 0  }
   0x5   :  { %s665_s11 = smov 0   ;;  %s667_s12 = smov 0  }
   0x6 LB: > { %s682_s13 = sadd.s32 4294967295, %s636_s12   ;;  %s356_s14 = sadd.s32 4294967294, %s636_s12   ;;  %s636_s12 = sphi %s667_s12, %s876_s12   ;;  %s632_s11 = sphi %s665_s11, %s875_s11   ;;  %s628_s10 = sphi %s663_s10, %s874_s10   ;;  %s624_s9 = sphi %s661_s9, %s873_s9  }
   0x7   : > { %p39_p0 = scmp.ne.s32.totalorder %s628_s10, %s624_s9  ;;  %p858_p1 = scmp.eq.s32.totalorder %s682_s13, 0 }
   0x8   : > { %p90_p3 = scmp.eq.s32.totalorder %s356_s14, 3  ;;  %p357_p5 = scmp.ge.s32.totalorder %s636_s12, 1 }
   0x9   : > { %p691_p4 = por %p858_p1, %p39_p0  ;;  %p97_p7 = scmp.lt.s32.totalorder %s636_s12, 5 }
   0xa   : > { %p696_p6 = por %p90_p3, %p39_p0  ;;  %s638_s18 = smov [#allocation5]  }
   0xb   : > { %s861_s15 = scalar_select %p691_p4, 1, 0 }
   0xc   : > { %s862_s16 = scalar_select %p696_p6, 1, 0 }
   0xd   : > { %p701_p8 = pnand %p357_p5, %p97_p7  ;;  %s109_s19 = sshll.u32 %s638_s18, 4  ;;  %s110_s19 = int_to_ptr.vmem [resolvable:$true] %s109_s19 }
   0xe   : > { %s714_s21 = sadd.s32 1, %s636_s12   ;;  %s26_s22 = sadd.s32 1, %s632_s11 }
   0xf   : > { %s863_s17 = scalar_select %p701_p8, 1, 0 }
  0x10   : > { %p454_p9 = pneg %p701_p8  ;;  %s23_s23 = ssub.s32 %s636_s12, %s714_s21 }
  0x11   : > { %s508_s26 = scalar_lea.hbm %s856_s1, 2048 }
  0x12   : > { %p709_p10 = pnand %p454_p9, %p858_p1  ;;  %p509_p11 = scmp.ne.s32.totalorder %s856_s1, %s508_s26 }
  0x13   : > { %p515_p3 = scmp.lt.u32.totalorder %s508_s26, %s856_s1 }
  0x14   : > { %p510_p12 = pneg %p709_p10 }
  0x16   : > { %p511_p13 = pnand %p510_p12, %p509_p11 }
  0x18   : > { %p512_p0 = pneg %p511_p13 }
  0x1a   : > { %p517_p5 = pnand %p515_p3, %p512_p0 }
  0x1c   : > { %520 = shalt.err (!%p517_p5)
}
  0x1d   : > { %s521_s3 = scalar_lea.vmem %s110_s19, 2048  ;;  %p529_p2 = scmp.lt.s32.totalorder %s110_s19, %s110_s19 }
  0x1e   : > { %p522_p7 = scmp.ne.s32.totalorder %s110_s19, %s521_s3  ;;  %p530_p6 = scmp.lt.s32.totalorder %s521_s3, %s521_s3 }
  0x20   : > { %p524_p9 = pnand %p522_p7, %p510_p12  ;;  %p531_p4 = por %p530_p6, %p529_p2 }
  0x22   : > { %p525_p1 = pneg %p524_p9 }
  0x24   : > { %p532_p8 = pnand %p531_p4, %p525_p1 }
  0x26   : > { %535 = shalt.err (!%p532_p8)
}
  0x27   : > { %s639_s4 = smov 128   ;;  %s640_s5 = smov 8  }
  0x28   : > { %457 = dma.hbm_to_vmem [thread:$0]  (!%p709_p10), %s856_s1, 2048, %s110_s19, [#allocation6], %s639_s4, %s639_s4, %s640_s5  }
  0x29   : > { %p24_p11 = scmp.eq.s32.totalorder %s23_s23, 0  ;;  %p33_p2 = scmp.ne.s32.totalorder %s632_s11, %s628_s10 }
  0x2a   : > { %p34_p1 = scmp.eq.s32.totalorder %s636_s12, 0  ;;  %p467_p4 = scmp.lt.s32.totalorder %s636_s12, 4 }
  0x2b   : > { %s740_s8 = scalar_select %p24_p11, %s632_s11, %s26_s22  }
  0x2c   : > { %p35_p6 = por %p34_p1, %p33_p2  ;;  %p865_p8 = scmp.eq.s32.totalorder %s682_s13, 3 }
  0x2d   : > { %s123_s18 = sand.u32 1, %s632_s11   ;;  %s361_s24 = sshll.u32 %s636_s12, 7 }
  0x2e   : > { %p744_p12 = por %p865_p8, %p33_p2  ;;  %s360_s25 = sshll.u32 %s123_s18, 3 }
  0x2f   : > { %s753_s27 = scalar_lea.hbm %s855_s0, %s361_s24  ;;  %s127_s19 = scalar_lea.vmem [#allocation2], %s360_s25 }
  0x30   : > { %s134_s22 = sshll.u32 %s127_s19, 4  ;;  %p755_p10 = pnand %p467_p4, %p35_p6  ;;  %s759_s22 = int_to_ptr.vmem [resolvable:$true] %s134_s22 }
  0x31   : > { %s124_s28 = scalar_lea.sflag [#allocation3], %s123_s18  ;;  %s536_s29 = scalar_lea.hbm %s753_s27, 128 }
  0x32   : > { %p537_p13 = scmp.ne.s32.totalorder %s753_s27, %s536_s29  ;;  %p538_p0 = pneg %p755_p10 }
  0x33   : > { %s541_s4 = scalar_lea.hbm %s855_s0, 512  ;;  %p542_p7 = scmp.lt.u32.totalorder %s753_s27, %s855_s0 }
  0x34   : > { %p539_p3 = pnand %p538_p0, %p537_p13  ;;  %p543_p9 = scmp.lt.u32.totalorder %s541_s4, %s536_s29 }
  0x35   : > { %p545_p2 = scmp.lt.u32.totalorder %s536_s29, %s753_s27 }
  0x36   : > { %p540_p5 = pneg %p539_p3  ;;  %p544_p11 = por %p543_p9, %p542_p7 }
  0x38   : > { %p546_p1 = por %p545_p2, %p544_p11 }
  0x3a   : > { %p547_p4 = pnand %p546_p1, %p540_p5 }
  0x3c   : > { %550 = shalt.err (!%p547_p4)
}
  0x3d   : > { %s551_s7 = scalar_lea.vmem %s759_s22, 128  ;;  %s641_s18 = smov [#allocation2]  }
  0x3e   : > { %p552_p6 = scmp.ne.s32.totalorder %s759_s22, %s551_s7  ;;  %s556_s24 = sshll.u32 %s641_s18, 4  ;;  %s557_s24 = int_to_ptr.vmem [resolvable:$false] %s556_s24 }
  0x3f   : > { %s558_s25 = scalar_lea.vmem %s557_s24, 256  ;;  %p559_p3 = scmp.lt.s32.totalorder %s759_s22, %s557_s24 }
  0x40   : > { %p554_p8 = pnand %p552_p6, %p538_p0  ;;  %p560_p7 = scmp.lt.s32.totalorder %s558_s25, %s551_s7 }
  0x42   : > { %p555_p13 = pneg %p554_p8  ;;  %p561_p9 = por %p560_p7, %p559_p3 }
  0x44   : > { %p562_p11 = pnand %p561_p9, %p555_p13 }
  0x46   : > { %565 = shalt.err (!%p562_p11)
}
  0x47   : > { %461 = dma.hbm_to_vmem [thread:$0]  (!%p755_p10), %s753_s27, 128, %s759_s22, %s124_s28  }
  0x48   : > { %p868_p5 = scmp.ne.s32.totalorder %s863_s17, 0 }
  0x49   : > { %s789_s20 = sand.u32 (!%p868_p5), 1, %s628_s10   ;;  %p869_p0 = scmp.ne.s32.totalorder (!%p868_p5), %s861_s15, 0 }
  0x4a   : > { %143 = sbr.rel (%p868_p5) target bundleno = 345 (0x159), region = 28  ;;  %s363_s26 = sshll.u32 (!%p868_p5), %s789_s20, 3 }
  0x4b   : > { %s146_s19 = scalar_lea.sflag (!%p868_p5), [#allocation3], %s789_s20  ;;  %s795_s29 = scalar_lea.vmem (!%p868_p5), [#allocation2], %s363_s26 }
  0x51   : > { %611 = dma.done.wait (%p869_p0), %s146_s19, 128  }
  0x52   : > { %613 = vsyncadd (%p869_p0), %s146_s19, 4294967168  ;;  %p870_p10 = scmp.eq.s32.totalorder %s682_s13, 0 }
  0x54   : > { %615 = dma.done.wait (%p870_p10), [#allocation6], 2048   ;;  %p871_p2 = pmov %p870_p10 }
  0x55   : > { %v642_v0 = vmov 0.0|0.0   ;;  %vm643_vm0 = vmmov 0   ;;  %v644_v1 = vmov 0.0   ;;  %v175_v2 = vld [vmem:[#allocation5] sm:$0xff]  ;;  %v176_v3 = vld [vmem:[#allocation5 + $0x8] sm:$0xff]  ;;  %v177_v4 = vld [vmem:[#allocation5 + $0x10] sm:$0xff] }
  0x56   : > { %617 = vsyncadd (%p871_p2), [#allocation6], 4294965248  ;;  %422 = vmatprep.subr.bf16.mxu0 %v642_v0  ;;  %419 = vmatprep.mubr.msk.f32.mxu0 %vm643_vm0, %v644_v1  ;;  %v423_v5 = vpack.c.bf16 %v176_v3, %v175_v2  ;;  %v178_v6 = vld [vmem:[#allocation5 + $0x18] sm:$0xff]  ;;  %v179_v8 = vld [vmem:[#allocation5 + $0x20] sm:$0xff]  ;;  %s173_s15 = scalar_lea.vmem [#allocation7], %s363_s26  ;;  %s367_s27 = sshll.u32 %s682_s13, 7 }
  0x57   : > { %v426_v7 = vpack.c.bf16 %v178_v6, %v177_v4  ;;  %v180_v9 = vld [vmem:[#allocation5 + $0x28] sm:$0xff]  ;;  %v181_v11 = vld [vmem:[#allocation5 + $0x30] sm:$0xff]  ;;  %v182_v12 = vld [vmem:[#allocation5 + $0x38] sm:$0xff]  ;;  %s276_s17 = sshll.u32 %s173_s15, 4  ;;  %s814_s28 = scalar_lea.hbm %s857_s2, %s367_s27  ;;  %s809_s17 = int_to_ptr.vmem [resolvable:$true] %s276_s17 }
  0x58   : > { %424 = vmatpush3.bf16.msra.mxu0 %v423_v5  ;;  %v429_v10 = vpack.c.bf16 %v180_v9, %v179_v8  ;;  %v432_v13 = vpack.c.bf16 %v182_v12, %v181_v11  ;;  %v183_v14 = vld [vmem:[#allocation5 + $0x40] sm:$0xff]  ;;  %v184_v15 = vld [vmem:[#allocation5 + $0x48] sm:$0xff]  ;;  %v185_v17 = vld [vmem:[#allocation5 + $0x50] sm:$0xff]  ;;  %s263_s30 = scalar_lea.sflag [#allocation4], %s789_s20  ;;  %s566_s3 = scalar_lea.vmem %s809_s17, 128 }
  0x59   : > { %425 = vmatprep.subr.bf16.mxu0 %v642_v0  ;;  %v435_v16 = vpack.c.bf16 %v184_v15, %v183_v14  ;;  %v186_v18 = vld [vmem:[#allocation5 + $0x58] sm:$0xff]  ;;  %v187_v20 = vld [vmem:[#allocation5 + $0x60] sm:$0xff]  ;;  %v188_v21 = vld [vmem:[#allocation5 + $0x68] sm:$0xff]  ;;  %p567_p1 = scmp.ne.s32.totalorder %s809_s17, %s566_s3  ;;  %s645_s13 = smov [#allocation7]  }
  0x5a   : > { %v438_v19 = vpack.c.bf16 %v186_v18, %v185_v17  ;;  %v441_v22 = vpack.c.bf16 %v188_v21, %v187_v20  ;;  %v189_v23 = vld [vmem:[#allocation5 + $0x70] sm:$0xff]  ;;  %v190_v24 = vld [vmem:[#allocation5 + $0x78] sm:$0xff]  ;;  %s570_s4 = sshll.u32 %s645_s13, 4  ;;  %s571_s4 = int_to_ptr.vmem [resolvable:$false] %s570_s4 }
  0x5b   : > { %v444_v25 = vpack.c.bf16 %v190_v24, %v189_v23  ;;  %v174_v26 = vld [vmem:[%s795_s29] sm:$0xff]  ;;  %p568_p4 = pnand %p567_p1, %p744_p12  ;;  %s572_s5 = scalar_lea.vmem %s571_s4, 256 }
  0x5c   : > { %427 = vmatpush3.bf16.msra.mxu0 %v426_v7  ;;  %p573_p8 = scmp.lt.s32.totalorder %s809_s17, %s571_s4  ;;  %p574_p13 = scmp.lt.s32.totalorder %s572_s5, %s566_s3 }
  0x5d   : > { %428 = vmatprep.subr.bf16.mxu0 %v642_v0  ;;  %p569_p6 = pneg %p568_p4 }
  0x5e   : > { %p575_p3 = por %p574_p13, %p573_p8 }
  0x60   : > { %430 = vmatpush3.bf16.msra.mxu0 %v429_v10  ;;  %p576_p7 = pnand %p575_p3, %p569_p6 }
  0x61   : > { %431 = vmatprep.subr.bf16.mxu0 %v642_v0 }
  0x64   : > { %433 = vmatpush3.bf16.msra.mxu0 %v432_v13 }
  0x65   : > { %434 = vmatprep.subr.bf16.mxu0 %v642_v0 }
  0x68   : > { %436 = vmatpush3.bf16.msra.mxu0 %v435_v16 }
  0x69   : > { %437 = vmatprep.subr.bf16.mxu0 %v642_v0 }
  0x6c   : > { %439 = vmatpush3.bf16.msra.mxu0 %v438_v19 }
  0x6d   : > { %440 = vmatprep.subr.bf16.mxu0 %v642_v0 }
  0x70   : > { %442 = vmatpush3.bf16.msra.mxu0 %v441_v22 }
  0x71   : > { %443 = vmatprep.subr.bf16.mxu0 %v642_v0 }
  0x74   : > { %445 = vmatpush3.bf16.msra.mxu0 %v444_v25 }
  0x77   : > { %420 = vmatmul.mubr.f32.vlgmr.msra.gmra.mrb[0].mxu0 %v174_v26 }
 0x14a   : > { %v257_v27 = vpop.f32.mrb[0].mxu0 }
 0x14b   : > { %261 = vst [vmem:[%s173_s15] sm:$0xff] %v257_v27  ;;  %v421_v28 = vpop.f32.mrb[1].mxu0 }
 0x14c   : > { %579 = shalt.err (!%p576_p7)
}
 0x14d   : > { %s580_s6 = scalar_lea.hbm %s814_s28, 128  ;;  %s584_s24 = scalar_lea.hbm %s857_s2, 512 }
 0x14e   : > { %p581_p9 = scmp.ne.s32.totalorder %s814_s28, %s580_s6  ;;  %p585_p0 = scmp.lt.u32.totalorder %s814_s28, %s857_s2 }
 0x14f   : > { %p586_p10 = scmp.lt.u32.totalorder %s584_s24, %s580_s6  ;;  %p588_p1 = scmp.lt.u32.totalorder %s580_s6, %s814_s28 }
 0x150   : > { %p582_p11 = pnand %p581_p9, %p744_p12 }
 0x151   : > { %p587_p2 = por %p586_p10, %p585_p0 }
 0x152   : > { %p583_p5 = pneg %p582_p11 }
 0x153   : > { %p589_p4 = por %p588_p1, %p587_p2 }
 0x155   : > { %p590_p6 = pnand %p589_p4, %p583_p5 }
 0x157   : > { %593 = shalt.err (!%p590_p6)
}
 0x158   : > { %452 = dma.vmem_to_hbm [thread:$0]  (%p744_p12), %s809_s17, 128, %s814_s28, %s263_s30  }
 0x159 PF: > { %p469_p8 = scmp.ge.s32.totalorder %s636_s12, 2  ;;  %s288_s26 = sand.u32 1, %s624_s9  }
 0x15a   : > { %p872_p13 = scmp.ne.s32.totalorder %s862_s16, 0  ;;  %s289_s19 = scalar_lea.sflag [#allocation4], %s288_s26 }
 0x15c   : > { %p463_p3 = pnand %p469_p8, %p872_p13 }
 0x15e   : > { %619 = dma.done.wait (!%p463_p3), %s289_s19, 128  }
 0x15f   : > { %621 = vsyncadd (!%p463_p3), %s289_s19, 4294967168  ;;  %p16_p7 = scmp.ge.s32.totalorder %s714_s21, 6   ;;  %s873_s9 = smov %s628_s10 }
 0x160   : > { %s874_s10 = smov %s632_s11  ;;  %s875_s11 = smov %s740_s8 }
 0x161   : > { %s876_s12 = smov %s714_s21  ;;  %18 = sbr.rel (!%p16_p7) target bundleno = 6 (0x6), region = 77 }
 0x168   :  { %294 = vsyncpa [#allocation3], 1 }
 0x169   :  { %296 = vsyncpa [#allocation3 + $0x1], 1 }
 0x16a   :  { %297 = vsyncpa [#allocation6], 1 }
 0x16b   :  { %298 = vsyncpa [#allocation4], 1 }
 0x16c   :  { %300 = vsyncpa [#allocation4 + $0x1], 1 }

</bundles_post_ra>
